<compile_context>
chip_gen: v6e
topology: v6e:2x2x1
jax: 0.10.0
libtpu: 0.0.40
codegen_flags: <defaults>
</compile_context>

<pallas_src>
import functools
import math

import jax
import jax.numpy as jnp
from jax.experimental import pallas as pl
from jax.experimental.pallas import tpu as pltpu


def _round_up(x, m):
    return (x + m - 1) // m * m


# ----------------------------------------------------------------------------
# Generic linear kernel:  out[tile_m, H_out] = x[tile_m, H_in] @ W + b
# ----------------------------------------------------------------------------
def _linear_kernel(x_ref, w_ref, b_ref, o_ref):
    y = jnp.dot(x_ref[...], w_ref[...], preferred_element_type=jnp.float32)
    y = y + b_ref[...].astype(jnp.float32)
    o_ref[...] = y.astype(o_ref.dtype)


def _linear(x2d, w, b, *, tile_m=256):
    """x2d: [M, H_in] @ w: [H_in, H_out] + b: [H_out] -> [M, H_out]."""
    M, Hin = x2d.shape
    Hout = w.shape[1]
    itemsize = jnp.dtype(x2d.dtype).itemsize

    # Large row tile for MXU fill; pad M so any batch*seq works.
    tm = min(tile_m, _round_up(M, 8))
    Mp = _round_up(M, tm)
    if Mp != M:
        x2d = jnp.pad(x2d, ((0, Mp - M), (0, 0)))
    b2d = b.reshape(1, Hout)

    # Rough double-buffered VMEM residency; only raise the scoped limit when
    # the default would be tight (cap at v7x's 64 MiB VMEM).
    resident = 2 * (tm * Hin + tm * Hout + Hin * Hout + Hout) * itemsize
    cparams = dict(dimension_semantics=("parallel",))
    if resident > 12 * 1024 * 1024:
        cparams["vmem_limit_bytes"] = min(int(resident * 3 // 2), 64 * 1024 * 1024)

    out = pl.pallas_call(
        _linear_kernel,
        out_shape=jax.ShapeDtypeStruct((Mp, Hout), x2d.dtype),
        grid=(Mp // tm,),
        in_specs=[
            pl.BlockSpec((tm, Hin), lambda i: (i, 0)),
            # Whole weight / bias, constant block index across the grid.
            # TODO(synk): pipeline_mode=pl.Buffered(1) on these constant blocks
            # would drop the unused second buffer and free VMEM for larger tiles.
            pl.BlockSpec((Hin, Hout), lambda i: (0, 0)),
            pl.BlockSpec((1, Hout), lambda i: (0, 0)),
        ],
        out_specs=pl.BlockSpec((tm, Hout), lambda i: (i, 0)),
        compiler_params=pltpu.CompilerParams(**cparams),
        cost_estimate=pl.CostEstimate(
            flops=2 * Mp * Hin * Hout,
            transcendentals=0,
            bytes_accessed=(Mp * Hin + Hin * Hout + Hout + Mp * Hout) * itemsize,
        ),
    )(x2d, w, b2d)
    return out[:M]


# ----------------------------------------------------------------------------
# Per-(batch, head) scaled-dot-product attention kernel.
# Refs (leading batch/head dims squeezed by the BlockSpec):
#   q_ref: (Lq, Dh)  k_ref/v_ref: (Lk, Dh)  [m_ref: (Lq, Lk)]
#   ctx_ref: (Lq, Dh)  attn_ref: (Lq, Lk)
# ----------------------------------------------------------------------------
def _attention_body(q_ref, k_ref, v_ref, m_ref, ctx_ref, attn_ref, scale):
    q = q_ref[...].astype(jnp.float32)
    k = k_ref[...].astype(jnp.float32)
    v = v_ref[...]
    scores = jnp.dot(q, k.T, preferred_element_type=jnp.float32) * scale
    if m_ref is not None:
        scores = jnp.where(m_ref[...] == 0, -1e10, scores)
    m = jnp.max(scores, axis=-1, keepdims=True)
    p = jnp.exp(scores - m)
    attn = p / jnp.sum(p, axis=-1, keepdims=True)
    attn_ref[...] = attn.astype(attn_ref.dtype)
    # TODO(synk): training-mode dropout on `attn` would need pltpu.prng_seed +
    # pltpu.prng_random_bits; eval mode == identity (matches module.eval()).
    ctx = jnp.dot(attn.astype(v.dtype), v, preferred_element_type=jnp.float32)
    ctx_ref[...] = ctx.astype(ctx_ref.dtype)


def _attn_kernel_nomask(q_ref, k_ref, v_ref, ctx_ref, attn_ref, *, scale):
    _attention_body(q_ref, k_ref, v_ref, None, ctx_ref, attn_ref, scale)


def _attn_kernel_mask(q_ref, k_ref, v_ref, m_ref, ctx_ref, attn_ref, *, scale):
    _attention_body(q_ref, k_ref, v_ref, m_ref, ctx_ref, attn_ref, scale)


# ----------------------------------------------------------------------------
# Full MultiHeadAttentionLayer forward.
# ----------------------------------------------------------------------------
def multi_head_attention(query, key, value, params, *, heads_num, mask=None,
                         tile_m=256):
    """query: [B, Lq, H]; key/value: [B, Lk, H]; weights are [in, out].

    Returns (x: [B, Lq, H], attention: [B, heads, Lq, Lk]).
    """
    B, Lq, H = query.shape
    _, Lk, _ = key.shape
    assert H % heads_num == 0
    Dh = H // heads_num
    dtype = query.dtype
    itemsize = jnp.dtype(dtype).itemsize

    # 1) Q/K/V projections — big row-tiled MXU matmuls over flattened tokens.
    q_p = _linear(query.reshape(B * Lq, H), params["wq"], params["bq"], tile_m=tile_m)
    k_p = _linear(key.reshape(B * Lk, H), params["wk"], params["bk"], tile_m=tile_m)
    v_p = _linear(value.reshape(B * Lk, H), params["wv"], params["bv"], tile_m=tile_m)

    # 2) Split heads: [B, L, H] -> [B, heads, L, Dh] (layout plumbing in XLA).
    q_h = q_p.reshape(B, Lq, heads_num, Dh).transpose(0, 2, 1, 3)
    k_h = k_p.reshape(B, Lk, heads_num, Dh).transpose(0, 2, 1, 3)
    v_h = v_p.reshape(B, Lk, heads_num, Dh).transpose(0, 2, 1, 3)

    scale = 1.0 / math.sqrt(Dh)
    q_spec = pl.BlockSpec((None, None, Lq, Dh), lambda b, h: (b, h, 0, 0))
    kv_spec = pl.BlockSpec((None, None, Lk, Dh), lambda b, h: (b, h, 0, 0))
    attn_spec = pl.BlockSpec((None, None, Lq, Lk), lambda b, h: (b, h, 0, 0))

    in_specs = [q_spec, kv_spec, kv_spec]
    inputs = [q_h, k_h, v_h]
    if mask is not None:
        m = jnp.asarray(mask)
        if m.ndim == 4:           # [B, 1, (Lq|1), Lk] -> drop the head axis
            m = m[:, 0]
        m = jnp.broadcast_to(m, (B, Lq, Lk)).astype(jnp.int32)
        in_specs.append(pl.BlockSpec((None, Lq, Lk), lambda b, h: (b, 0, 0)))
        inputs.append(m)
        kernel = functools.partial(_attn_kernel_mask, scale=scale)
    else:
        kernel = functools.partial(_attn_kernel_nomask, scale=scale)

    ctx, attention = pl.pallas_call(
        kernel,
        out_shape=(
            jax.ShapeDtypeStruct((B, heads_num, Lq, Dh), dtype),
            jax.ShapeDtypeStruct((B, heads_num, Lq, Lk), dtype),
        ),
        grid=(B, heads_num),
        in_specs=in_specs,
        out_specs=(q_spec, attn_spec),
        compiler_params=pltpu.CompilerParams(
            dimension_semantics=("parallel", "parallel")),
        cost_estimate=pl.CostEstimate(
            flops=4 * B * heads_num * Lq * Lk * Dh,
            transcendentals=B * heads_num * Lq * Lk,
            bytes_accessed=B * heads_num * (2 * Lq * Dh + 2 * Lk * Dh + Lq * Lk) * itemsize,
        ),
    )(*inputs)

    # 3) Merge heads and apply the output projection.
    ctx2d = ctx.transpose(0, 2, 1, 3).reshape(B * Lq, H)
    x = _linear(ctx2d, params["wo"], params["bo"], tile_m=tile_m)
    return x.reshape(B, Lq, H), attention


# ----------------------------------------------------------------------------
# Pure-JAX reference (mirrors the PyTorch forward exactly).
# ----------------------------------------------------------------------------
def _ref_mha(query, key, value, params, heads_num, mask=None):
    B, Lq, H = query.shape
    Lk = key.shape[1]
    Dh = H // heads_num
    q = query @ params["wq"] + params["bq"]
    k = key @ params["wk"] + params["bk"]
    v = value @ params["wv"] + params["bv"]
    q = q.reshape(B, Lq, heads_num, Dh).transpose(0, 2, 1, 3)
    k = k.reshape(B, Lk, heads_num, Dh).transpose(0, 2, 1, 3)
    v = v.reshape(B, Lk, heads_num, Dh).transpose(0, 2, 1, 3)
    energy = jnp.einsum("bhqd,bhkd->bhqk", q, k) * (1.0 / math.sqrt(Dh))
    if mask is not None:
        m = jnp.asarray(mask)
        if m.ndim == 4:
            m = m[:, 0]
        m = jnp.broadcast_to(m, (B, Lq, Lk))
        energy = jnp.where(m[:, None, :, :] == 0, -1e10, energy)
    attn = jax.nn.softmax(energy, axis=-1)
    x = jnp.einsum("bhqk,bhkd->bhqd", attn, v)
    x = x.transpose(0, 2, 1, 3).reshape(B, Lq, H)
    x = x @ params["wo"] + params["bo"]
    return x, attn


if __name__ == "__main__":
    batch, seq, hidden, heads = 2, 8, 32, 4
    dropout = 0.1  # identity at inference

    key0 = jax.random.PRNGKey(0)
    keys = jax.random.split(key0, 12)
    lim = 1.0 / math.sqrt(hidden)

    def _w(k):
        return jax.random.uniform(k, (hidden, hidden), minval=-lim, maxval=lim,
                                  dtype=jnp.float32)

    def _b(k):
        return jax.random.uniform(k, (hidden,), minval=-lim, maxval=lim,
                                  dtype=jnp.float32)

    params = {
        "wq": _w(keys[0]), "bq": _b(keys[1]),
        "wk": _w(keys[2]), "bk": _b(keys[3]),
        "wv": _w(keys[4]), "bv": _b(keys[5]),
        "wo": _w(keys[6]), "bo": _b(keys[7]),
    }
    query = jax.random.normal(keys[8], (batch, seq, hidden), dtype=jnp.float32)
    key_t = jax.random.normal(keys[9], (batch, seq, hidden), dtype=jnp.float32)
    value = jax.random.normal(keys[10], (batch, seq, hidden), dtype=jnp.float32)

    # --- no-mask path ---
    x_out, attn_out = multi_head_attention(query, key_t, value, params,
                                           heads_num=heads, mask=None)
    x_out = jax.block_until_ready(x_out)
    attn_out = jax.block_until_ready(attn_out)
    x_ref, attn_ref = _ref_mha(query, key_t, value, params, heads)
    assert x_out.shape == (batch, seq, hidden)
    assert attn_out.shape == (batch, heads, seq, seq)
    assert jnp.allclose(x_out, x_ref, atol=2e-4, rtol=2e-4), "x mismatch (no mask)"
    assert jnp.allclose(attn_out, attn_ref, atol=2e-4, rtol=2e-4), "attn mismatch (no mask)"

    # --- masked path (pad out the last 2 key positions of batch item 1) ---
    pad_mask = jnp.ones((batch, 1, seq), dtype=jnp.int32).at[1, 0, -2:].set(0)
    x_m, attn_m = multi_head_attention(query, key_t, value, params,
                                       heads_num=heads, mask=pad_mask)
    x_m = jax.block_until_ready(x_m)
    attn_m = jax.block_until_ready(attn_m)
    x_mref, attn_mref = _ref_mha(query, key_t, value, params, heads, mask=pad_mask)
    assert jnp.allclose(x_m, x_mref, atol=2e-4, rtol=2e-4), "x mismatch (mask)"
    assert jnp.allclose(attn_m, attn_mref, atol=2e-4, rtol=2e-4), "attn mismatch (mask)"
    assert float(attn_m[1, :, :, -2:].max()) < 1e-6, "masked keys received attention"

    print("KERNEL_OK")
</pallas_src>

<mosaic_0001>
module attributes {stable_mosaic.version = 11 : i64} {
  func.func @_linear_kernel(%arg0: i32, %arg1: memref<16x32xf32, #tpu.memory_space<vmem>>, %arg2: memref<32x32xf32, #tpu.memory_space<vmem>>, %arg3: memref<1x32xf32, #tpu.memory_space<vmem>>, %arg4: memref<16x32xf32, #tpu.memory_space<vmem>>) attributes {dimension_semantics = [#tpu.dimension_semantics<parallel>], iteration_bounds = array<i64: 1>, scalar_prefetch = 0 : i64, scratch_operands = 0 : i64, tpu.core_type = #tpu.core_type<tc>, window_params = [{transform_indices = @transform_0, window_bounds = array<i64: 16, 32>}, {pipeline_mode = #tpu.pipeline_mode<synchronous>, transform_indices = @transform_1, window_bounds = array<i64: 32, 32>}, {pipeline_mode = #tpu.pipeline_mode<synchronous>, transform_indices = @transform_2, window_bounds = array<i64: 1, 32>}, {transform_indices = @transform_3, window_bounds = array<i64: 16, 32>}]} {
    %c0 = arith.constant 0 : index
    %c0_0 = arith.constant 0 : index
    %0 = vector.load %arg1[%c0, %c0_0] : memref<16x32xf32, #tpu.memory_space<vmem>>, vector<16x32xf32>
    %c0_1 = arith.constant 0 : index
    %c0_2 = arith.constant 0 : index
    %1 = vector.load %arg2[%c0_1, %c0_2] : memref<32x32xf32, #tpu.memory_space<vmem>>, vector<32x32xf32>
    %cst = arith.constant dense<0.000000e+00> : vector<16x32xf32>
    %2 = tpu.matmul %0, %1, %cst {dimension_numbers = #tpu.dot_dimension_numbers<[1], [0], [0], [1], [0, 0, 1, 1], [], []>} : vector<16x32xf32>, vector<32x32xf32>, vector<16x32xf32> -> vector<16x32xf32>
    %c0_3 = arith.constant 0 : index
    %c0_4 = arith.constant 0 : index
    %3 = vector.load %arg3[%c0_3, %c0_4] : memref<1x32xf32, #tpu.memory_space<vmem>>, vector<1x32xf32>
    %4 = vector.broadcast %3 : vector<1x32xf32> to vector<16x32xf32>
    %5 = arith.addf %2, %4 : vector<16x32xf32>
    %c0_5 = arith.constant 0 : index
    %c0_6 = arith.constant 0 : index
    %6 = vector.load %arg4[%c0_5, %c0_6] : memref<16x32xf32, #tpu.memory_space<vmem>>, vector<16x32xf32>
    tpu.vector_store %arg4[%c0_5, %c0_6], %5 {strides = array<i32>} : memref<16x32xf32, #tpu.memory_space<vmem>>, vector<16x32xf32>,
    return
  }
  func.func @transform_0(%arg0: i32) -> (i32, i32) {
    %c0_i32 = arith.constant 0 : i32
    %c0_i32_0 = arith.constant 0 : i32
    return %arg0, %c0_i32 : i32, i32
  }
  func.func @transform_1(%arg0: i32) -> (i32, i32) {
    %c0_i32 = arith.constant 0 : i32
    %c0_i32_0 = arith.constant 0 : i32
    %c0_i32_1 = arith.constant 0 : i32
    return %c0_i32, %c0_i32_0 : i32, i32
  }
  func.func @transform_2(%arg0: i32) -> (i32, i32) {
    %c0_i32 = arith.constant 0 : i32
    %c0_i32_0 = arith.constant 0 : i32
    %c0_i32_1 = arith.constant 0 : i32
    return %c0_i32, %c0_i32_0 : i32, i32
  }
  func.func @transform_3(%arg0: i32) -> (i32, i32) {
    %c0_i32 = arith.constant 0 : i32
    %c0_i32_0 = arith.constant 0 : i32
    return %arg0, %c0_i32 : i32, i32
  }
}

</mosaic_0001>

<bundles_post_ra>
// kernel: tpu_custom_call.1
= control target key start
LH: loop header
LB: loop body
LE: loop exit
PB: predicated region body
PF: predicated region fallthrough
CT: control target
= control target key end

     0   :  { %8 = vsyncpa [#allocation3], 0  ;;  %s299_s0 = inlined_call_operand.hbm [shape: f32[16,32], index: 0, kind: input, shape index: {}]   ;;  %s300_s1 = inlined_call_operand.hbm [shape: f32[32,32], index: 1, kind: input, shape index: {}]   ;;  %s301_s2 = inlined_call_operand.vmem [shape: f32[1,32], index: 2, kind: input, shape index: {}]   ;;  %s302_s3 = inlined_call_operand.hbm [shape: f32[16,32], index: 3, kind: output, shape index: {}]  }
   0x1   :  { %9 = vsyncpa [#allocation6], 0 }
   0x2   :  { %10 = vsyncpa [#allocation4], 0  ;;  %s249_s12 = smov [#allocation2]  }
   0x3   :  { %s16_s13 = sshll.u32 %s249_s12, 4  ;;  %s17_s13 = int_to_ptr.vmem [resolvable:$true] %s16_s13 }
   0x4   :  { %s191_s14 = scalar_lea.vmem %s17_s13, 256  ;;  %p196_p1 = scmp.lt.s32.totalorder %s17_s13, %s17_s13 }
   0x5   :  { %p192_p0 = scmp.ne.s32.totalorder %s17_s13, %s191_s14  ;;  %p197_p2 = scmp.lt.s32.totalorder %s191_s14, %s191_s14 }
   0x7   :  { %p198_p3 = por %p197_p2, %p196_p1 }
   0x9   :  { %p199_p4 = pnand %p198_p3, %p192_p0 }
   0xb   :  { %202 = shalt.err (!%p199_p4)
}
   0xc   :  { %s250_s15 = smov 128   ;;  %s251_s16 = smov 8  }
   0xd   :  { %22 = dma.hbm_to_vmem [thread:$0]  %s299_s0, 256, %s17_s13, [#allocation3], %s250_s15, %s250_s15, %s251_s16  }
   0xe   :  { %s252_s19 = smov [#allocation5]  }
   0xf   :  { %s28_s20 = sshll.u32 %s252_s19, 4  ;;  %s29_s20 = int_to_ptr.vmem [resolvable:$true] %s28_s20 }
  0x10   :  { %s211_s21 = scalar_lea.vmem %s29_s20, 512  ;;  %p216_p6 = scmp.lt.s32.totalorder %s29_s20, %s29_s20 }
  0x11   :  { %p212_p5 = scmp.ne.s32.totalorder %s29_s20, %s211_s21  ;;  %p217_p7 = scmp.lt.s32.totalorder %s211_s21, %s211_s21 }
  0x13   :  { %p218_p8 = por %p217_p7, %p216_p6 }
  0x15   :  { %p219_p9 = pnand %p218_p8, %p212_p5 }
  0x17   :  { %222 = shalt.err (!%p219_p9)
}
  0x18   :  { %34 = dma.hbm_to_vmem [thread:$0]  %s300_s1, 512, %s29_s20, [#allocation6], %s250_s15, %s250_s15, %s251_s16  }
  0x19   :  { %243 = dma.done.wait [#allocation3], 256  }
  0x1a   :  { %244 = vsyncadd [#allocation3], 4294967040 }
  0x1b   :  { %245 = dma.done.wait [#allocation6], 512  }
  0x1c   :  { %246 = vsyncadd [#allocation6], 4294966784  ;;  %vm56_vm0 = vcmask 261120   ;;  %v48_v0 = vld [vmem:[#allocation5 + $0x18] sm:$0xff]  ;;  %v47_v1 = vld [vmem:[#allocation5 + $0x10] sm:$0xff]  ;;  %s253_s24 = smov [#allocation7]  }
  0x1d   :  { %167 = vmatprep.subr.mxu0 %v48_v0  ;;  %v43_v2 = vld [vmem:[#allocation2] sm:$0xff]  ;;  %v46_v3 = vld [vmem:[#allocation5 + $0x8] sm:$0xff]  ;;  %v45_v4 = vld [vmem:[#allocation5] sm:$0xff]  ;;  %s145_s25 = sshll.u32 %s253_s24, 4  ;;  %s146_s25 = int_to_ptr.vmem [resolvable:$true] %s145_s25 }
  0x1e   :  { %168 = vmatpush3.msra.mxu0 %v48_v0  ;;  %175 = vmatprep.mubr.msk.f32.mxu0 %vm56_vm0, %v43_v2  ;;  %v44_v5 = vld [vmem:[#allocation2 + $0x8] sm:$0xff]  ;;  %v158_v6 = vld [vmem:[%s301_s2] ss:$0 sm:$0xff]  ;;  %s223_s26 = scalar_lea.vmem %s146_s25, 256  ;;  %p228_p11 = scmp.lt.s32.totalorder %s146_s25, %s146_s25 }
  0x1f   :  { %169 = vmatprep.subr.mxu0 %v47_v1  ;;  %p224_p10 = scmp.ne.s32.totalorder %s146_s25, %s223_s26  ;;  %p229_p12 = scmp.lt.s32.totalorder %s223_s26, %s223_s26 }
  0x20   :  { %170 = vmatpush3.msra.mxu0 %v47_v1 }
  0x21   :  { %171 = vmatprep.subr.mxu0 %v46_v3  ;;  %p230_p13 = por %p229_p12, %p228_p11 }
  0x22   :  { %172 = vmatpush3.msra.mxu0 %v46_v3 }
  0x23   :  { %173 = vmatprep.subr.mxu0 %v45_v4  ;;  %p231_p0 = pnand %p230_p13, %p224_p10 }
  0x24   :  { %174 = vmatpush3.msra.mxu0 %v45_v4 }
  0x25   :  { %176 = vmatmul.mubr.msk.f32.vlgmr.msra.gmra.mxu0 %vm56_vm0, %v44_v5 }
  0xe5   :  { %v177_v7 = vpop.f32.mrf.mxu0 }
  0xe6   :  { %v135_v8 = vadd.f32 %v177_v7, %v158_v6 }
  0xe7   :  { %v129_v9 = vpop.f32.mrf.mxu0 }
  0xe8   :  { %139 = vst.msk [vmem:[#allocation7 + $0x8] sm:$0xff] %vm56_vm0, %v135_v8  ;;  %v130_v10 = vadd.f32 %v158_v6, %v129_v9 }
  0xea   :  { %138 = vst.msk [vmem:[#allocation7] sm:$0xff] %vm56_vm0, %v130_v10 }
  0xeb   :  { %234 = shalt.err (!%p231_p0)
}
  0xec   :  { %151 = dma.vmem_to_hbm [thread:$0]  %s146_s25, 256, %s302_s3, [#allocation4], %s250_s15, %s250_s15, %s251_s16  }
  0xed   :  { %247 = dma.done.wait [#allocation4], 256  }
  0xee   :  { %248 = vsyncadd [#allocation4], 4294967040 }
  0xef   :  { %155 = vsyncpa [#allocation3], 1 }
  0xf0   :  { %156 = vsyncpa [#allocation6], 1 }
  0xf1   :  { %157 = vsyncpa [#allocation4], 1 }

</bundles_post_ra>
